<compile_context>
chip_gen: v5e
topology: v5e:2x2
jax: 0.10.0
libtpu: 0.0.40
codegen_flags: <defaults>
</compile_context>

<pallas_src>
import jax
import jax.numpy as jnp
from jax import lax
from jax.experimental import pallas as pl
from jax.experimental.pallas import tpu as pltpu

_LANE = 128
_SUBLANE = 8
_CHUNK_ROWS = 256                      # 256*128 f32 = 128 KiB live per chunk
_TARGET_BLOCK_BYTES = 2 * 1024 * 1024  # HBM bytes per input per grid step


def _sublane_multiple(dtype) -> int:
    """Required row-block multiple for packed sub-32-bit dtypes."""
    return {4: 8, 2: 16, 1: 32}.get(jnp.dtype(dtype).itemsize, 8)


def _make_sse_kernel(blk_rows: int, chunk_rows: int):
    """Sum of squared errors over (blk_rows, 128) blocks.

    Grid is (n_cores, n_inner); the output block (one (8,128) lane-resident
    accumulator per core) is resident across the inner reduction axis.
    """
    n_chunks = blk_rows // chunk_rows
    groups = chunk_rows // _SUBLANE

    def kernel(yh_ref, y_ref, o_ref):
        i = pl.program_id(1)

        @pl.when(i == 0)
        def _init():
            o_ref[...] = jnp.zeros_like(o_ref)

        def chunk_body(c, carry):
            r0 = pl.multiple_of(c * chunk_rows, chunk_rows)
            d = (yh_ref[pl.ds(r0, chunk_rows), :].astype(jnp.float32)
                 - y_ref[pl.ds(r0, chunk_rows), :].astype(jnp.float32))
            # Lane-resident partial sums: reduce only across sublane groups
            # (pure VPU adds); carry stays vreg-shaped (8, 128).
            return carry + jnp.sum(
                (d * d).reshape(groups, _SUBLANE, _LANE), axis=0)

        o_ref[...] += lax.fori_loop(
            0, n_chunks, chunk_body,
            jnp.zeros((_SUBLANE, _LANE), jnp.float32),
            unroll=True)

    return kernel


def _bulk_sse(yh2d, y2d, blk_rows: int, chunk_rows: int,
              n_cores: int, n_inner: int) -> jax.Array:
    """SSE over a (n_cores * n_inner * blk_rows, 128) pair of arrays."""
    n_elems = n_cores * n_inner * blk_rows * _LANE
    in_bytes = n_elems * (jnp.dtype(yh2d.dtype).itemsize
                          + jnp.dtype(y2d.dtype).itemsize)
    out = pl.pallas_call(
        _make_sse_kernel(blk_rows, chunk_rows),
        out_shape=jax.ShapeDtypeStruct((n_cores * _SUBLANE, _LANE), jnp.float32),
        grid_spec=pltpu.PrefetchScalarGridSpec(
            num_scalar_prefetch=0,
            grid=(n_cores, n_inner),
            in_specs=[
                pl.BlockSpec((blk_rows, _LANE),
                             lambda c, i: (c * n_inner + i, 0)),
                pl.BlockSpec((blk_rows, _LANE),
                             lambda c, i: (c * n_inner + i, 0)),
            ],
            # One lane-dense (8,128) partial per core; summed in the wrapper.
            out_specs=pl.BlockSpec((_SUBLANE, _LANE), lambda c, i: (c, 0)),
        ),
        compiler_params=pltpu.CompilerParams(
            # Leading axis splits rows across v7x's two TensorCores; trailing
            # axis is the sequential reduction.
            dimension_semantics=("parallel", "arbitrary"),
            vmem_limit_bytes=32 * 1024 * 1024,
        ),
        cost_estimate=pl.CostEstimate(
            flops=3 * n_elems,
            transcendentals=0,
            bytes_accessed=in_bytes + n_cores * _SUBLANE * _LANE * 4,
        ),
    )(yh2d, y2d)
    return jnp.sum(out)


def rmse_pallas(y_hat: jax.Array, y: jax.Array) -> jax.Array:
    """RMSE over all elements of y_hat / y (any matching shape / dtype)."""
    assert y_hat.shape == y.shape, "y_hat and y must have the same shape"
    n = int(y_hat.size)
    if n == 0:
        return jnp.float32(jnp.nan)  # mean of an empty tensor

    yh_flat = jnp.ravel(y_hat)
    y_flat = jnp.ravel(y)

    rows = n // _LANE  # fully-populated 128-lane rows
    mult = max(_sublane_multiple(y_hat.dtype), _sublane_multiple(y.dtype))
    itemsize = max(jnp.dtype(y_hat.dtype).itemsize, jnp.dtype(y.dtype).itemsize)

    # ~2 MiB of HBM per input per grid step, rounded to the packing multiple.
    pref_rows = (_TARGET_BLOCK_BYTES // (_LANE * itemsize) // mult) * mult
    blk_rows = min(pref_rows, (rows // mult) * mult)

    sse = jnp.float32(0.0)
    n_bulk = 0
    if blk_rows > 0:
        # Chunk the in-kernel compute; fall back to a single chunk for small
        # blocks that are not a multiple of _CHUNK_ROWS (one-off inputs only).
        chunk_rows = _CHUNK_ROWS if blk_rows % _CHUNK_ROWS == 0 else blk_rows
        n_blocks = rows // blk_rows
        n_cores = 2 if n_blocks >= 2 else 1
        n_inner = n_blocks // n_cores
        bulk_rows = n_cores * n_inner * blk_rows
        n_bulk = bulk_rows * _LANE
        yh2d = yh_flat[:n_bulk].reshape(bulk_rows, _LANE)
        y2d = y_flat[:n_bulk].reshape(bulk_rows, _LANE)
        sse = _bulk_sse(yh2d, y2d, blk_rows, chunk_rows, n_cores, n_inner)

    if n_bulk < n:
        # Remainder (< 2 row-blocks + <128-element tail): tiny plain-jnp reduce.
        td = (yh_flat[n_bulk:].astype(jnp.float32)
              - y_flat[n_bulk:].astype(jnp.float32))
        sse = sse + jnp.sum(td * td)

    return jnp.sqrt(sse / jnp.float32(n))


class RMSE:
    """JAX/Pallas analogue of the PyTorch RMSE metric module."""

    def __init__(self):
        self.name = "rmse"

    def __call__(self, y_hat: jax.Array, y: jax.Array) -> jax.Array:
        return rmse_pallas(y_hat, y)


if __name__ == "__main__":
    metric = RMSE()
    key = jax.random.PRNGKey(0)

    # Small 4D channel-first images, consistent with the reference metric.
    k1, k2 = jax.random.split(key)
    y_hat = jax.random.normal(k1, (2, 4, 16, 16), dtype=jnp.float32)
    y = jax.random.normal(k2, (2, 4, 16, 16), dtype=jnp.float32)
    score = metric(y_hat, y)
    jax.block_until_ready(score)
    ref = jnp.sqrt(jnp.mean((y_hat - y) ** 2))
    assert jnp.allclose(score, ref, rtol=1e-5, atol=1e-6), (score, ref)

    # Medium case exercising the multi-block grid, the 2-core split and the
    # plain-jnp remainder path.
    k3, k4 = jax.random.split(k2)
    y_hat2 = jax.random.normal(k3, (4, 3, 300, 300), dtype=jnp.float32)
    y2 = jax.random.normal(k4, (4, 3, 300, 300), dtype=jnp.float32)
    score2 = metric(y_hat2, y2)
    jax.block_until_ready(score2)
    ref2 = jnp.sqrt(jnp.mean((y_hat2 - y2) ** 2))
    assert jnp.allclose(score2, ref2, rtol=1e-4, atol=1e-6), (score2, ref2)

    print("KERNEL_OK")
</pallas_src>

<mosaic_0001>
module attributes {stable_mosaic.version = 11 : i64} {
  func.func @kernel(%arg0: i32, %arg1: i32, %arg2: memref<16x128xf32, #tpu.memory_space<vmem>>, %arg3: memref<16x128xf32, #tpu.memory_space<vmem>>, %arg4: memref<8x128xf32, #tpu.memory_space<vmem>>) attributes {dimension_semantics = [#tpu.dimension_semantics<parallel>, #tpu.dimension_semantics<arbitrary>], iteration_bounds = array<i64: 1, 1>, scalar_prefetch = 0 : i64, scratch_operands = 0 : i64, tpu.core_type = #tpu.core_type<tc>, window_params = [{transform_indices = @transform_0, window_bounds = array<i64: 16, 128>}, {transform_indices = @transform_1, window_bounds = array<i64: 16, 128>}, {transform_indices = @transform_2, window_bounds = array<i64: 8, 128>}]} {
    %c0_i32 = arith.constant 0 : i32
    %0 = arith.cmpi eq, %arg1, %c0_i32 : i32
    %1 = arith.extui %0 : i1 to i32
    %c0_i32_0 = arith.constant 0 : i32
    %2 = arith.cmpi ne, %1, %c0_i32_0 : i32
    scf.if %2 {
      %cst_8 = arith.constant 0.000000e+00 : f32
      %18 = vector.broadcast %cst_8 : f32 to vector<8x128xf32>
      %c0_9 = arith.constant 0 : index
      %c0_10 = arith.constant 0 : index
      %19 = vector.load %arg4[%c0_9, %c0_10] : memref<8x128xf32, #tpu.memory_space<vmem>>, vector<8x128xf32>
      tpu.vector_store %arg4[%c0_9, %c0_10], %18 {strides = array<i32>} : memref<8x128xf32, #tpu.memory_space<vmem>>, vector<8x128xf32>,
    } else {
    }
    %c0 = arith.constant 0 : index
    %c0_1 = arith.constant 0 : index
    %3 = vector.load %arg4[%c0, %c0_1] : memref<8x128xf32, #tpu.memory_space<vmem>>, vector<8x128xf32>
    %cst = arith.constant 0.000000e+00 : f32
    %4 = vector.broadcast %cst : f32 to vector<8x128xf32>
    %c0_i32_2 = arith.constant 0 : i32
    %c16_i32 = arith.constant 16 : i32
    %5 = arith.muli %c0_i32_2, %c16_i32 : i32
    %6 = tpu.assume_multiple %5, 16 : i32
    %7 = arith.index_cast %6 : i32 to index
    %c0_3 = arith.constant 0 : index
    %8 = vector.load %arg2[%7, %c0_3] : memref<16x128xf32, #tpu.memory_space<vmem>>, vector<16x128xf32>
    %9 = arith.index_cast %6 : i32 to index
    %c0_4 = arith.constant 0 : index
    %10 = vector.load %arg3[%9, %c0_4] : memref<16x128xf32, #tpu.memory_space<vmem>>, vector<16x128xf32>
    %11 = arith.subf %8, %10 : vector<16x128xf32>
    %12 = arith.mulf %11, %11 : vector<16x128xf32>
    %13 = vector.shape_cast %12 : vector<16x128xf32> to vector<2x8x128xf32>
    %cst_5 = arith.constant dense<0.000000e+00> : vector<8x128xf32>
    %14 = vector.multi_reduction <add>, %13, %cst_5 [0] : vector<2x8x128xf32> to vector<8x128xf32>
    %15 = arith.addf %4, %14 : vector<8x128xf32>
    %c1_i32 = arith.constant 1 : i32
    %16 = arith.addf %3, %15 : vector<8x128xf32>
    %c0_6 = arith.constant 0 : index
    %c0_7 = arith.constant 0 : index
    %17 = vector.load %arg4[%c0_6, %c0_7] : memref<8x128xf32, #tpu.memory_space<vmem>>, vector<8x128xf32>
    tpu.vector_store %arg4[%c0_6, %c0_7], %16 {strides = array<i32>} : memref<8x128xf32, #tpu.memory_space<vmem>>, vector<8x128xf32>,
    return
  }
  func.func @transform_0(%arg0: i32, %arg1: i32) -> (i32, i32) {
    %c1_i32 = arith.constant 1 : i32
    %0 = arith.muli %arg0, %c1_i32 : i32
    %1 = arith.addi %0, %arg1 : i32
    %c0_i32 = arith.constant 0 : i32
    %c0_i32_0 = arith.constant 0 : i32
    return %1, %c0_i32 : i32, i32
  }
  func.func @transform_1(%arg0: i32, %arg1: i32) -> (i32, i32) {
    %c1_i32 = arith.constant 1 : i32
    %0 = arith.muli %arg0, %c1_i32 : i32
    %1 = arith.addi %0, %arg1 : i32
    %c0_i32 = arith.constant 0 : i32
    %c0_i32_0 = arith.constant 0 : i32
    return %1, %c0_i32 : i32, i32
  }
  func.func @transform_2(%arg0: i32, %arg1: i32) -> (i32, i32) {
    %c0_i32 = arith.constant 0 : i32
    %c0_i32_0 = arith.constant 0 : i32
    return %arg0, %c0_i32 : i32, i32
  }
}

</mosaic_0001>

<bundles_post_ra>
// kernel: tpu_custom_call.1
= control target key start
LH: loop header
LB: loop body
LE: loop exit
PB: predicated region body
PF: predicated region fallthrough
CT: control target
= control target key end

     0   :  { %7 = vsyncpa [#allocation3], 0  ;;  %s205_s0 = inlined_call_operand.hbm [shape: f32[16,128], index: 0, kind: input, shape index: {}]   ;;  %s206_s1 = inlined_call_operand.hbm [shape: f32[16,128], index: 1, kind: input, shape index: {}]   ;;  %s207_s2 = inlined_call_operand.hbm [shape: f32[8,128], index: 2, kind: output, shape index: {}]  }
   0x1   :  { %8 = vsyncpa [#allocation6], 0 }
   0x2   :  { %9 = vsyncpa [#allocation4], 0  ;;  %s18_s11 = sshll.u32 %s205_s0, 4  ;;  %s176_s12 = smov [#allocation2]   ;;  %s19_s11 = int_to_ptr.hbm [resolvable:$true] %s18_s11 }
   0x3   :  { %s20_s13 = sshll.u32 %s176_s12, 4  ;;  %s35_s16 = sshll.u32 %s206_s1, 4  ;;  %s21_s13 = int_to_ptr.vmem [resolvable:$true] %s20_s13  ;;  %s36_s16 = int_to_ptr.hbm [resolvable:$true] %s35_s16 }
   0x4   :  { %s177_s17 = smov 128   ;;  %s178_s18 = smov 8  }
   0x5   :  { %26 = dma.hbm_to_vmem [thread:$0]  %s19_s11, 256, %s21_s13, [#allocation3], %s177_s17, %s177_s17, %s178_s18  }
   0x6   :  { %s179_s19 = smov [#allocation5]  }
   0x7   :  { %s37_s20 = sshll.u32 %s179_s19, 4  ;;  %s38_s20 = int_to_ptr.vmem [resolvable:$true] %s37_s20 }
   0x8   :  { %43 = dma.hbm_to_vmem [thread:$0]  %s36_s16, 256, %s38_s20, [#allocation6], %s177_s17, %s177_s17, %s178_s18  }
   0x9   :  { %170 = dma.done.wait [#allocation3], 256  }
   0xa   :  { %171 = vsyncadd [#allocation3], 4294967040 }
   0xb   :  { %172 = dma.done.wait [#allocation6], 256  }
   0xc   :  { %173 = vsyncadd [#allocation6], 4294967040  ;;  %v62_v0 = vld [vmem:[#allocation2] sm:$0xff]  ;;  %v63_v1 = vld [vmem:[#allocation2 + $0x8] sm:$0xff]  ;;  %s180_s0 = smov [#allocation7]   ;;  %s81_s23 = sshll.u32 %s207_s2, 4  ;;  %s82_s23 = int_to_ptr.hbm [resolvable:$true] %s81_s23 }
   0xd   :  { %v64_v2 = vld [vmem:[#allocation5] sm:$0xff]  ;;  %v65_v3 = vld [vmem:[#allocation5 + $0x8] sm:$0xff]  ;;  %s79_s1 = sshll.u32 %s180_s0, 4  ;;  %s80_s1 = int_to_ptr.vmem [resolvable:$true] %s79_s1 }
   0xe   :  { %v66_v4 = vsub.f32 %v62_v0, %v64_v2  ;;  %v67_v5 = vsub.f32 %v63_v1, %v65_v3 }
  0x10   :  { %v68_v6 = vmul.f32 %v66_v4, %v66_v4  ;;  %v69_v7 = vmul.f32 %v67_v5, %v67_v5 }
  0x12   :  { %v70_v8 = vadd.f32 %v69_v7, %v68_v6 }
  0x14   :  { %73 = vst [vmem:[#allocation7] sm:$0xff] %v70_v8 }
  0x15   :  { %84 = dma.vmem_to_hbm [thread:$0]  %s80_s1, 128, %s82_s23, [#allocation4]  }
  0x16   :  { %174 = dma.done.wait [#allocation4], 128  }
  0x17   :  { %175 = vsyncadd [#allocation4], 4294967168 }
  0x18   :  { %89 = vsyncpa [#allocation3], 1 }
  0x19   :  { %90 = vsyncpa [#allocation6], 1 }
  0x1a   :  { %91 = vsyncpa [#allocation4], 1 }

</bundles_post_ra>
